<compile_context>
chip_gen: v7x
topology: tpu7x:2x2x1
jax: 0.10.0
libtpu: 0.0.40
codegen_flags: <defaults>
</compile_context>

<pallas_src>
import functools

import numpy as np
import jax
import jax.numpy as jnp
from jax.experimental import pallas as pl
from jax.experimental.pallas import tpu as pltpu


_NEG = jnp.float32(-1e30)   # "-inf" for padded label rows (exp underflows to 0)


def _round_up(x, m):
    return ((x + m - 1) // m) * m


def _masked_ce_kernel(slab_ref, out_ref, acc_ref, *, n_labels):
    """One [Lmax+3, T] slab block; accumulates weighted NLL over lanes."""
    j = pl.program_id(1)

    @pl.when(j == 0)
    def _():
        acc_ref[...] = jnp.zeros_like(acc_ref)

    L = n_labels
    blk = slab_ref[...]                                   # [L+3, T] f32
    lab = blk[0:L, :]                                     # [L, T]
    dep = blk[L:L + 1, :]                                 # [1, T]
    gold = blk[L + 1:L + 2, :].astype(jnp.int32)          # [1, T] small ints
    w = blk[L + 2:L + 3, :]                               # [1, T] mask / count

    logits = lab + dep                                    # [L, T]

    # logsumexp over concat([logits, 0]) -- the implicit "no-span" zero logit.
    m = jnp.maximum(jnp.max(logits, axis=0, keepdims=True), 0.0)      # [1, T]
    lse = m + jnp.log(jnp.sum(jnp.exp(logits - m), axis=0, keepdims=True)
                      + jnp.exp(-m))                                  # [1, T]

    # Gold-class logit via sublane-iota compare.  gold >= L (no-span fill or
    # other-key padding) matches no row and yields the appended 0 logit.
    sub = jax.lax.broadcasted_iota(jnp.int32, logits.shape, 0)        # [L, T]
    gold_logit = jnp.sum(jnp.where(sub == gold, logits, 0.0),
                         axis=0, keepdims=True)                       # [1, T]

    # Elementwise (VPU) accumulation -- no per-step cross-lane reduction.
    acc_ref[...] += (lse - gold_logit) * w

    @pl.when(j == pl.num_programs(1) - 1)
    def _():
        s = jnp.sum(acc_ref[...])                         # one XLU reduce per split
        out_ref[...] = jnp.zeros_like(out_ref) + s        # splat into (8,128) tile


def masked_weighted_nll_sum(slab_parts, n_labels, *, tile_lanes=32768, n_split=2):
    """slab_parts: list of [n_labels+3, Pk] f32 slabs.  Returns the scalar
    sum over all positions of (lse - gold_logit) * weight."""
    D = n_labels + 3
    P0 = sum(int(p.shape[1]) for p in slab_parts)

    # Large lane-dense tiles, clamped so tiny problems don't over-pad.
    tile = min(int(tile_lanes), _round_up(-(-P0 // n_split), 128))
    nblocks = -(-P0 // (n_split * tile))
    P = n_split * nblocks * tile

    parts = list(slab_parts)
    if P != P0:   # tail padding fused into the same single concatenate
        parts.append(jnp.zeros((D, P - P0), jnp.float32))
    slab = parts[0] if len(parts) == 1 else jnp.concatenate(parts, axis=1)

    out = pl.pallas_call(
        functools.partial(_masked_ce_kernel, n_labels=n_labels),
        out_shape=jax.ShapeDtypeStruct((n_split * 8, 128), jnp.float32),
        grid_spec=pltpu.PrefetchScalarGridSpec(
            num_scalar_prefetch=0,
            grid=(n_split, nblocks),
            in_specs=[pl.BlockSpec((D, tile),
                                   lambda i, j: (0, i * nblocks + j))],
            out_specs=pl.BlockSpec((8, 128), lambda i, j: (i, 0)),
            scratch_shapes=[pltpu.VMEM((1, tile), jnp.float32)]),
        compiler_params=pltpu.CompilerParams(
            dimension_semantics=("parallel", "arbitrary")),
    )(slab)
    # One partial sum per split (splatted over its (8,128) tile) -> reduce in JAX.
    return jnp.sum(out.reshape(n_split, 8, 128)[:, 0, 0])


def batch_unstructured_approx_prob_loss(dep_weights, label_weights, sentences,
                                        *, tile_lanes=32768, n_split=2):
    """JAX/Pallas equivalent of BatchUnstructuredApproximateProbLoss.forward
    (joint=True, reduction='mean').
      dep_weights[k]:   [B, N+1, N+1, 1]  float32
      label_weights[k]: [B, N+1, N+1, L]  float32
      sentences: list of dicts with 'words', k+'_spans' (x, y), k+'_labels'.
    """
    dep_w = {k: v[:, 1:, 1:] for k, v in dep_weights.items()}
    lab_w = {k: v[:, 1:, 1:] for k, v in label_weights.items()}
    keys = list(dep_w.keys())
    first = dep_w[keys[0]]
    B, N = int(first.shape[0]), int(first.shape[1])
    Pk = B * N * N
    Lmax = max(int(lab_w[k].shape[3]) for k in keys)

    # Triangle & sentence-size mask (identical for every key).
    sizes = jnp.array([len(s['words']) for s in sentences], jnp.int32)
    tri = jnp.triu(jnp.ones((N, N), dtype=bool), k=0)
    szm = jnp.arange(N)[None, :] < sizes[:, None]
    mask_f = (tri[None, :, :] & szm[:, :, None] & szm[:, None, :]).astype(jnp.float32)
    # Fold each key's 'mean' denominator into the mask weight so the kernel
    # only needs one global weighted sum.  (NaN on an all-empty batch, like torch.)
    wmask = (mask_f / jnp.sum(mask_f)).reshape(1, Pk)

    slab_parts = []
    for k in keys:
        L = int(lab_w[k].shape[3])
        lab = lab_w[k].astype(jnp.float32).reshape(Pk, L).T          # [L, Pk]
        dep = dep_w[k][..., 0].astype(jnp.float32).reshape(1, Pk)    # [1, Pk]

        # Gold index grid; Lmax (never matched by the sublane iota) == "no-span".
        gold = jnp.full((B, N, N), Lmax, dtype=jnp.int32)
        for b in range(B):
            x = jnp.asarray(sentences[b][k + '_spans'][0], jnp.int32)
            y = jnp.asarray(sentences[b][k + '_spans'][1], jnp.int32)
            z = jnp.asarray(sentences[b][k + '_labels'], jnp.int32)
            gold = gold.at[b, x, y].set(z)
        gold_f = gold.astype(jnp.float32).reshape(1, Pk)

        rows = [lab]
        if L < Lmax:
            rows.append(jnp.full((Lmax - L, Pk), _NEG, jnp.float32))
        rows += [dep, gold_f, wmask]
        slab_parts.append(jnp.concatenate(rows, axis=0))             # [Lmax+3, Pk]

    return masked_weighted_nll_sum(slab_parts, Lmax,
                                   tile_lanes=tile_lanes, n_split=n_split)


def _reference_loss(dep_weights, label_weights, sentences):
    """Pure-JAX reference of the same joint/mean forward (for verification)."""
    dep_w = {k: v[:, 1:, 1:] for k, v in dep_weights.items()}
    lab_w = {k: v[:, 1:, 1:] for k, v in label_weights.items()}
    first = next(iter(dep_w.values()))
    n_batch, n_max_words = first.shape[0], first.shape[1]
    triangle = jnp.triu(jnp.ones((n_max_words, n_max_words), dtype=bool), k=0)
    sizes = jnp.array([len(s['words']) for s in sentences], dtype=jnp.int32)
    size_mask = jnp.arange(n_max_words)[None, :] < sizes[:, None]
    mask = triangle[None, :, :] & size_mask[:, :, None] & size_mask[:, None, :]
    total = jnp.float32(0.0)
    for k in dep_w.keys():
        L = lab_w[k].shape[3]
        logits = dep_w[k] + lab_w[k]                                  # [B,N,N,L]
        logits = jnp.concatenate(
            [logits, jnp.zeros(logits.shape[:-1] + (1,), logits.dtype)], axis=-1)
        gold = jnp.full((n_batch, n_max_words, n_max_words), L, dtype=jnp.int32)
        for b in range(n_batch):
            x = jnp.asarray(sentences[b][k + '_spans'][0], dtype=jnp.int32)
            y = jnp.asarray(sentences[b][k + '_spans'][1], dtype=jnp.int32)
            z = jnp.asarray(sentences[b][k + '_labels'], dtype=jnp.int32)
            gold = gold.at[b, x, y].set(z)
        logp = jax.nn.log_softmax(logits, axis=-1)
        nll = -jnp.take_along_axis(logp, gold[..., None], axis=-1)[..., 0]
        m = mask.astype(jnp.float32)
        total = total + jnp.sum(nll * m) / jnp.sum(m)
    return total


if __name__ == "__main__":
    # Small synthetic problem: B=2, (N+1)=9 -> N=8 words max, two span types.
    B, N1 = 2, 9
    span_keys = ["cont", "disc"]
    n_labels = {"cont": 6, "disc": 4}

    key = jax.random.PRNGKey(0)
    dep_weights, label_weights = {}, {}
    for kname in span_keys:
        key, k1, k2 = jax.random.split(key, 3)
        dep_weights[kname] = jax.random.normal(k1, (B, N1, N1, 1), jnp.float32)
        label_weights[kname] = jax.random.normal(
            k2, (B, N1, N1, n_labels[kname]), jnp.float32)

    # Deterministic synthetic sentences with gold spans/labels.
    rng = np.random.RandomState(0)
    sent_lens = [8, 5]
    sentences = []
    for b in range(B):
        n = sent_lens[b]
        sent = {"words": ["w%d" % t for t in range(n)]}
        for kname in span_keys:
            spans = [(i, j) for i in range(n) for j in range(i, n)]
            rng.shuffle(spans)
            m = min(4, len(spans))
            xs = np.array([s[0] for s in spans[:m]], dtype=np.int32)
            ys = np.array([s[1] for s in spans[:m]], dtype=np.int32)
            zs = rng.randint(0, n_labels[kname], size=m).astype(np.int32)
            sent[kname + "_spans"] = (xs, ys)
            sent[kname + "_labels"] = zs
        sentences.append(sent)

    loss = batch_unstructured_approx_prob_loss(dep_weights, label_weights, sentences)
    loss = jax.block_until_ready(loss)

    ref = jax.block_until_ready(
        _reference_loss(dep_weights, label_weights, sentences))
    np.testing.assert_allclose(float(loss), float(ref), rtol=1e-3, atol=1e-3)

    print("KERNEL_OK")
</pallas_src>

<mosaic_0001>
module attributes {stable_mosaic.version = 11 : i64} {
  func.func @_masked_ce_kernel(%arg0: i32, %arg1: i32, %arg2: memref<9x128xf32, #tpu.memory_space<vmem>>, %arg3: memref<8x128xf32, #tpu.memory_space<vmem>>, %arg4: memref<1x128xf32, #tpu.memory_space<vmem>>) attributes {dimension_semantics = [#tpu.dimension_semantics<parallel>, #tpu.dimension_semantics<arbitrary>], iteration_bounds = array<i64: 2, 1>, scalar_prefetch = 0 : i64, scratch_operands = 1 : i64, tpu.core_type = #tpu.core_type<tc>, window_params = [{transform_indices = @transform_0, window_bounds = array<i64: 9, 128>}, {transform_indices = @transform_1, window_bounds = array<i64: 8, 128>}]} {
    %c0_i32 = arith.constant 0 : i32
    %0 = arith.cmpi eq, %arg1, %c0_i32 : i32
    %1 = arith.extui %0 : i1 to i32
    %c0_i32_0 = arith.constant 0 : i32
    %2 = arith.cmpi ne, %1, %c0_i32_0 : i32
    scf.if %2 {
      %cst_13 = arith.constant 0.000000e+00 : f32
      %41 = vector.broadcast %cst_13 : f32 to vector<1x128xf32>
      %c0_14 = arith.constant 0 : index
      %c0_15 = arith.constant 0 : index
      %42 = vector.load %arg4[%c0_14, %c0_15] : memref<1x128xf32, #tpu.memory_space<vmem>>, vector<1x128xf32>
      tpu.vector_store %arg4[%c0_14, %c0_15], %41 {strides = array<i32>} : memref<1x128xf32, #tpu.memory_space<vmem>>, vector<1x128xf32>,
    } else {
    }
    %c0 = arith.constant 0 : index
    %c0_1 = arith.constant 0 : index
    %3 = vector.load %arg2[%c0, %c0_1] : memref<9x128xf32, #tpu.memory_space<vmem>>, vector<9x128xf32>
    %4 = vector.extract_strided_slice %3 {offsets = [0, 0], sizes = [6, 128], strides = [1, 1]} : vector<9x128xf32> to vector<6x128xf32>
    %5 = vector.extract_strided_slice %3 {offsets = [6, 0], sizes = [1, 128], strides = [1, 1]} : vector<9x128xf32> to vector<1x128xf32>
    %6 = vector.extract_strided_slice %3 {offsets = [7, 0], sizes = [1, 128], strides = [1, 1]} : vector<9x128xf32> to vector<1x128xf32>
    %7 = arith.fptosi %6 : vector<1x128xf32> to vector<1x128xi32>
    %8 = vector.extract_strided_slice %3 {offsets = [8, 0], sizes = [1, 128], strides = [1, 1]} : vector<9x128xf32> to vector<1x128xf32>
    %9 = vector.broadcast %5 : vector<1x128xf32> to vector<6x128xf32>
    %10 = arith.addf %4, %9 : vector<6x128xf32>
    %cst = arith.constant dense<0xFF800000> : vector<128xf32>
    %11 = vector.multi_reduction <maximumf>, %10, %cst [0] : vector<6x128xf32> to vector<128xf32>
    %12 = vector.shape_cast %11 : vector<128xf32> to vector<1x128xf32>
    %cst_2 = arith.constant 0.000000e+00 : f32
    %13 = vector.broadcast %cst_2 : f32 to vector<1x128xf32>
    %14 = arith.maximumf %12, %13 : vector<1x128xf32>
    %15 = vector.broadcast %14 : vector<1x128xf32> to vector<6x128xf32>
    %16 = arith.subf %10, %15 : vector<6x128xf32>
    %17 = math.exp %16 : vector<6x128xf32>
    %cst_3 = arith.constant dense<0.000000e+00> : vector<128xf32>
    %18 = vector.multi_reduction <add>, %17, %cst_3 [0] : vector<6x128xf32> to vector<128xf32>
    %19 = vector.shape_cast %18 : vector<128xf32> to vector<1x128xf32>
    %cst_4 = arith.constant 0.000000e+00 : f32
    %20 = vector.broadcast %cst_4 : f32 to vector<1x128xf32>
    %21 = arith.subf %20, %14 : vector<1x128xf32>
    %22 = math.exp %21 : vector<1x128xf32>
    %23 = arith.addf %19, %22 : vector<1x128xf32>
    %24 = math.log %23 : vector<1x128xf32>
    %25 = arith.addf %14, %24 : vector<1x128xf32>
    %26 = tpu.iota {dimensions = array<i32: 0>} : vector<6x128xi32>
    %27 = vector.broadcast %7 : vector<1x128xi32> to vector<6x128xi32>
    %28 = arith.cmpi eq, %26, %27 : vector<6x128xi32>
    %cst_5 = arith.constant 0.000000e+00 : f32
    %29 = vector.broadcast %cst_5 : f32 to vector<6x128xf32>
    %30 = arith.select %28, %10, %29 : vector<6x128xi1>, vector<6x128xf32>
    %cst_6 = arith.constant dense<0.000000e+00> : vector<128xf32>
    %31 = vector.multi_reduction <add>, %30, %cst_6 [0] : vector<6x128xf32> to vector<128xf32>
    %32 = vector.shape_cast %31 : vector<128xf32> to vector<1x128xf32>
    %c0_7 = arith.constant 0 : index
    %c0_8 = arith.constant 0 : index
    %33 = vector.load %arg4[%c0_7, %c0_8] : memref<1x128xf32, #tpu.memory_space<vmem>>, vector<1x128xf32>
    %34 = arith.subf %25, %32 : vector<1x128xf32>
    %35 = arith.mulf %34, %8 : vector<1x128xf32>
    %36 = arith.addf %33, %35 : vector<1x128xf32>
    %c0_9 = arith.constant 0 : index
    %c0_10 = arith.constant 0 : index
    %37 = vector.load %arg4[%c0_9, %c0_10] : memref<1x128xf32, #tpu.memory_space<vmem>>, vector<1x128xf32>
    tpu.vector_store %arg4[%c0_9, %c0_10], %36 {strides = array<i32>} : memref<1x128xf32, #tpu.memory_space<vmem>>, vector<1x128xf32>,
    %c0_i32_11 = arith.constant 0 : i32
    %38 = arith.cmpi eq, %arg1, %c0_i32_11 : i32
    %39 = arith.extui %38 : i1 to i32
    %c0_i32_12 = arith.constant 0 : i32
    %40 = arith.cmpi ne, %39, %c0_i32_12 : i32
    scf.if %40 {
      %c0_13 = arith.constant 0 : index
      %c0_14 = arith.constant 0 : index
      %41 = vector.load %arg4[%c0_13, %c0_14] : memref<1x128xf32, #tpu.memory_space<vmem>>, vector<1x128xf32>
      %42 = vector.shape_cast %41 : vector<1x128xf32> to vector<1x1x128xf32>
      %cst_15 = arith.constant dense<0.000000e+00> : vector<1xf32>
      %43 = vector.multi_reduction <add>, %42, %cst_15 [1, 2] : vector<1x1x128xf32> to vector<1xf32>
      %44 = vector.shape_cast %43 : vector<1xf32> to vector<1x1x1xf32>
      %45 = vector.extract %44[0, 0, 0] : f32 from vector<1x1x1xf32>
      %cst_16 = arith.constant 0.000000e+00 : f32
      %46 = vector.broadcast %cst_16 : f32 to vector<8x128xf32>
      %47 = vector.broadcast %45 : f32 to vector<8x128xf32>
      %48 = arith.addf %46, %47 : vector<8x128xf32>
      %c0_17 = arith.constant 0 : index
      %c0_18 = arith.constant 0 : index
      %49 = vector.load %arg3[%c0_17, %c0_18] : memref<8x128xf32, #tpu.memory_space<vmem>>, vector<8x128xf32>
      tpu.vector_store %arg3[%c0_17, %c0_18], %48 {strides = array<i32>} : memref<8x128xf32, #tpu.memory_space<vmem>>, vector<8x128xf32>,
    } else {
    }
    return
  }
  func.func @transform_0(%arg0: i32, %arg1: i32) -> (i32, i32) {
    %c1_i32 = arith.constant 1 : i32
    %0 = arith.muli %arg0, %c1_i32 : i32
    %1 = arith.addi %0, %arg1 : i32
    %c0_i32 = arith.constant 0 : i32
    %c0_i32_0 = arith.constant 0 : i32
    return %c0_i32, %1 : i32, i32
  }
  func.func @transform_1(%arg0: i32, %arg1: i32) -> (i32, i32) {
    %c0_i32 = arith.constant 0 : i32
    %c0_i32_0 = arith.constant 0 : i32
    return %arg0, %c0_i32 : i32, i32
  }
}

</mosaic_0001>

<bundles_post_ra>
// kernel: tpu_custom_call.1
= control target key start
LH: loop header
LB: loop body
LE: loop exit
PB: predicated region body
PF: predicated region fallthrough
CT: control target
= control target key end

     0   :  { %6 = vsyncpa [#allocation4], 0  ;;  %s718_s0 = inlined_call_operand.hbm [shape: f32[9,256], index: 0, kind: input, shape index: {}]   ;;  %s719_s1 = inlined_call_operand.hbm [shape: f32[16,128], index: 1, kind: output, shape index: {}]  }
   0x1   :  { %8 = vsyncpa [#allocation4 + $0x1], 0 }
   0x2   :  { %9 = vsyncpa [#allocation5], 0 }
   0x3   :  { %11 = vsyncpa [#allocation5 + $0x1], 0  ;;  %s539_s6 = smov 0   ;;  %s541_s7 = smov 0  }
   0x4   :  { %s543_s8 = smov 0   ;;  %s545_s9 = smov 0  }
   0x5   :  { %s547_s10 = smov 0   ;;  %s549_s11 = smov 0  }
   0x6 LB: > { %s320_s12 = sadd.s32 4294967295, %s521_s11   ;;  %s321_s13 = sadd.s32 4294967294, %s521_s11   ;;  %s521_s11 = sphi %s549_s11, %s17_s11   ;;  %s517_s10 = sphi %s547_s10, %s733_s10   ;;  %s513_s9 = sphi %s545_s9, %s732_s9   ;;  %s509_s8 = sphi %s543_s8, %s731_s8   ;;  %s505_s7 = sphi %s541_s7, %s730_s7   ;;  %s501_s6 = sphi %s539_s6, %s729_s6  }
   0x7   : > { %s29_s14 = sadd.s32 1, %s517_s10  ;;  %s38_s15 = sadd.s32 1, %s509_s8 }
   0x8   : > { %p31_p0 = scmp.ge.s32.totalorder %s29_s14, 2  ;;  %p45_p1 = scmp.ne.s32.totalorder %s509_s8, %s505_s7 }
   0x9   : > { %p46_p2 = scmp.eq.s32.totalorder %s521_s11, 0  ;;  %p51_p3 = scmp.ne.s32.totalorder %s505_s7, %s501_s6 }
   0xa   : > { %s735_s14 = smov (%p31_p0, %s29_s14), 0  ;;  %p52_p5 = scmp.eq.s32.totalorder %s320_s12, 0 }
   0xb   : > { %p580_p4 = por %p46_p2, %p45_p1  ;;  %s35_s17 = ssub.s32 %s517_s10, %s735_s14 }
   0xc   : > { %p75_p6 = scmp.eq.s32.totalorder %s320_s12, 1  ;;  %p36_p7 = scmp.eq.s32.totalorder %s35_s17, 0 }
   0xd   : > { %p586_p8 = por %p52_p5, %p51_p3  ;;  %p81_p10 = scmp.eq.s32.totalorder %s321_s13, 1 }
   0xe   : > { %p590_p9 = por %p75_p6, %p45_p1  ;;  %p349_p13 = scmp.lt.s32.totalorder %s521_s11, 2 }
   0xf   : > { %s595_s20 = scalar_select %p36_p7, %s509_s8, %s38_s15  }
  0x10   : > { %s723_s19 = scalar_select %p590_p9, 1, 0 }
  0x11   : > { %p597_p11 = por %p81_p10, %p51_p3  ;;  %s101_s22 = sand.u32 1, %s509_s8  }
  0x12   : > { %s324_s23 = sshll.u32 %s101_s22, 4  ;;  %s325_s24 = sshll.u32 %s517_s10, 7 }
  0x13   : > { %s724_s21 = scalar_select %p597_p11, 1, 0 }
  0x14   : > { %s608_s27 = scalar_lea.hbm %s718_s0, %s325_s24  ;;  %s105_s28 = scalar_lea.vmem [#allocation3], %s324_s23 }
  0x15   : > { %s112_s29 = sshll.u32 %s105_s28, 4  ;;  %p614_p0 = pnand %p349_p13, %p580_p4  ;;  %s610_s29 = int_to_ptr.vmem [resolvable:$true] %s112_s29 }
  0x16   : > { %s618_s2 = scalar_lea.sflag [#allocation4], %s101_s22  ;;  %s409_s3 = scalar_lea.hbm %s608_s27, 256 }
  0x17   : > { %p410_p1 = scmp.ne.s32.totalorder %s608_s27, %s409_s3  ;;  %p411_p2 = pneg %p614_p0 }
  0x18   : > { %s414_s12 = scalar_lea.hbm %s718_s0, 512  ;;  %p415_p4 = scmp.lt.u32.totalorder %s608_s27, %s718_s0 }
  0x19   : > { %p412_p3 = pnand %p411_p2, %p410_p1  ;;  %p416_p6 = scmp.lt.u32.totalorder %s414_s12, %s409_s3 }
  0x1a   : > { %p418_p10 = scmp.lt.u32.totalorder %s409_s3, %s608_s27 }
  0x1b   : > { %p413_p5 = pneg %p412_p3  ;;  %p417_p7 = por %p416_p6, %p415_p4 }
  0x1d   : > { %p419_p13 = por %p418_p10, %p417_p7 }
  0x1f   : > { %p420_p12 = pnand %p419_p13, %p413_p5 }
  0x21   : > { %423 = shalt.err (!%p420_p12)
}
  0x22   : > { %s424_s16 = scalar_lea.vmem %s610_s29, 256  ;;  %s523_s17 = smov [#allocation3]  }
  0x23   : > { %p425_p1 = scmp.ne.s32.totalorder %s610_s29, %s424_s16  ;;  %s429_s22 = sshll.u32 %s523_s17, 4  ;;  %s430_s22 = int_to_ptr.vmem [resolvable:$false] %s429_s22 }
  0x24   : > { %s431_s23 = scalar_lea.vmem %s430_s22, 512  ;;  %p432_p9 = scmp.lt.s32.totalorder %s610_s29, %s430_s22 }
  0x25   : > { %p427_p3 = pnand %p425_p1, %p411_p2  ;;  %p433_p4 = scmp.lt.s32.totalorder %s431_s23, %s424_s16 }
  0x27   : > { %p428_p11 = pneg %p427_p3  ;;  %p434_p6 = por %p433_p4, %p432_p9 }
  0x29   : > { %p435_p7 = pnand %p434_p6, %p428_p11 }
  0x2b   : > { %438 = shalt.err (!%p435_p7)
}
  0x2c   : > { %s524_s24 = smov 256   ;;  %s525_s25 = smov 128  }
  0x2d   : > { %s526_s26 = smov 8   ;;  %p326_p12 = scmp.ge.s32.totalorder %s521_s11, 1 }
  0x2e   : > { %344 = dma.hbm_to_vmem [thread:$0]  (!%p614_p0), %s608_s27, 256, %s610_s29, %s618_s2, %s524_s24, %s525_s25, %s526_s26  }
  0x2f   : > { %p120_p2 = scmp.lt.s32.totalorder %s521_s11, 3 }
  0x31   : > { %p121_p5 = pnand %p326_p12, %p120_p2 }
  0x32   : > { %s649_s28 = sand.u32 (!%p121_p5), 1, %s505_s7  }
  0x33   : > { %124 = sbr.rel (%p121_p5) target bundleno = 363 (0x16b), region = 24  ;;  %s327_s3 = sshll.u32 (!%p121_p5), %s649_s28, 4 }
  0x34   : > { %s127_s4 = scalar_lea.sflag (!%p121_p5), [#allocation4], %s649_s28  ;;  %s653_s5 = scalar_lea.vmem (!%p121_p5), [#allocation3], %s327_s3 }
  0x3a   : > { %492 = dma.done.wait (%p586_p8), %s127_s4, 256  }
  0x3b   : > { %494 = vsyncadd (%p586_p8), %s127_s4, 4294967040  ;;  %v158_v0 = vlaneseq  ;;  %v527_v1 = vmov 0.0   ;;  %v155_v4 = vld [vmem:[%s653_s5] sm:$0xff]  ;;  %vm163_vm0 = vcmask 1045504   ;;  %v156_v44 = vld [vmem:[%s653_s5 + $0x8] sm:$0x1] }
  0x3c   : > { %154 = vst [vmem:[#allocation2] sm:$0x1] %v527_v1  ;;  %v333_v15 = vtrunc.f32 %v155_v4  ;;  %vm213_vm2 = vcmask 1040384   ;;  %s328_s18 = sshll.u32 %s649_s28, 3  ;;  %s330_s30 = sshll.u32 %s513_s9, 7 }
  0x3d   : > { %v159_v2 = vshrl.u32 %v158_v0, 7  ;;  %s148_s27 = scalar_lea.vmem [#allocation6], %s328_s18  ;;  %s671_s15 = scalar_lea.hbm %s719_s1, %s330_s30 }
  0x3e   : > { %v334_v18 = vcvt.f32.s32 %v333_v15  ;;  %s241_s29 = sshll.u32 %s148_s27, 4  ;;  %s228_s16 = scalar_lea.sflag [#allocation5], %s649_s28  ;;  %s666_s29 = int_to_ptr.vmem [resolvable:$true] %s241_s29 }
  0x3f   : > { %v160_v3 = vsub.s32 6, %v159_v2  ;;  %v193_v19 = vsub.s32 7, %v159_v2  ;;  %s439_s17 = scalar_lea.vmem %s666_s29, 128  ;;  %p726_p9 = scmp.ne.s32.totalorder %s723_s19, 0 }
  0x40   : > { %p440_p8 = scmp.ne.s32.totalorder %s666_s29, %s439_s17  ;;  %s528_s9 = smov [#allocation6]  }
  0x41   : > { %v161_v5 = vrot.slane %v155_v4, %v160_v3  ;;  %v194_v21 = vrot.slane %v334_v18, %v193_v19  ;;  %s443_s22 = sshll.u32 %s528_s9, 4  ;;  %s444_s22 = int_to_ptr.vmem [resolvable:$false] %s443_s22 }
  0x42   : > { %p441_p11 = pnand %p440_p8, %p726_p9  ;;  %s445_s23 = scalar_lea.vmem %s444_s22, 256 }
  0x43   : > { %v162_v6 = vadd.f32 %v161_v5, %v155_v4  ;;  %vm195_vm1 = vcmp.eq.s32.totalorder %v159_v2, %v194_v21  ;;  %v204_v46 = vld [vmem:[#allocation2] sm:$0x1]  ;;  %p446_p10 = scmp.lt.s32.totalorder %s666_s29, %s444_s22  ;;  %p447_p13 = scmp.lt.s32.totalorder %s445_s23, %s439_s17 }
  0x44   : > { %p442_p0 = pneg %p441_p11 }
  0x45   : > { %v164_v7 = vsel %vm163_vm0, %v162_v6, -inf  ;;  %v196_v25 = vsel %vm195_vm1, %v162_v6, 0.0  ;;  %p448_p1 = por %p447_p13, %p446_p10 }
  0x46   : > { %v165_v8 = vrot.slane %v164_v7, 4  ;;  %v197_v28 = vsel %vm163_vm0, %v196_v25, 0.0 }
  0x47   : > { %v198_v30 = vrot.slane %v197_v28, 4  ;;  %p449_p3 = pnand %p448_p1, %p442_p0 }
  0x48   : > { %v166_v9 = vmax.f32 %v164_v7, %v165_v8 }
  0x49   : > { %v199_v34 = vadd.f32 %v198_v30, %v197_v28 }
  0x4a   : > { %v167_v10 = vrot.slane %v166_v9, 2 }
  0x4b   : > { %v200_v37 = vrot.slane %v199_v34, 2 }
  0x4c   : > { %v168_v11 = vmax.f32 %v166_v9, %v167_v10 }
  0x4d   : > { %v201_v38 = vadd.f32 %v200_v37, %v199_v34 }
  0x4e   : > { %v169_v12 = vrot.slane %v168_v11, 1 }
  0x4f   : > { %v202_v39 = vrot.slane %v201_v38, 1 }
  0x50   : > { %v170_v13 = vmax.f32 %v168_v11, %v169_v12 }
  0x51   : > { %v203_v42 = vadd.f32 %v202_v39, %v201_v38 }
  0x52   : > { %v171_v14 = vmax.f32 %v170_v13, 0.0 }
  0x54   : > { %v172_v16 = vsub.f32 %v162_v6, %v171_v14  ;;  %v182_v20 = vsub.f32 0.0, %v171_v14 }
  0x56   : > { %v173_v17 = vmul.f32 1.442695, %v172_v16  ;;  %v183_v22 = vmul.f32 1.442695, %v182_v20 }
  0x58   : > { %403 = vpow2.f32 %v173_v17 }
  0x59   : > { %405 = vpow2.f32 %v183_v22 }
  0x62   : > { %v404_v23 = vpop.eup %403 }
  0x63   : > { %v175_v24 = vsel %vm163_vm0, %v404_v23, 0.0  ;;  %v406_v33 = vpop.eup %405 }
  0x64   : > { %v176_v26 = vrot.slane %v175_v24, 4 }
  0x66   : > { %v177_v27 = vadd.f32 %v176_v26, %v175_v24 }
  0x68   : > { %v178_v29 = vrot.slane %v177_v27, 2 }
  0x6a   : > { %v179_v31 = vadd.f32 %v178_v29, %v177_v27 }
  0x6c   : > { %v180_v32 = vrot.slane %v179_v31, 1 }
  0x6e   : > { %v181_v35 = vadd.f32 %v180_v32, %v179_v31 }
  0x70   : > { %v185_v36 = vadd.f32 %v406_v33, %v181_v35 }
  0x72   : > { %407 = vlog2.f32 %v185_v36 }
  0x7c   : > { %v408_v40 = vpop.eup %407 }
  0x7d   : > { %v187_v41 = vmul.f32 0.6931472, %v408_v40 }
  0x7f   : > { %v188_v43 = vadd.f32 %v187_v41, %v171_v14 }
  0x81   : > { %v205_v45 = vsub.f32 %v188_v43, %v203_v42 }
  0x83   : > { %v206_v47 = vmul.f32 %v205_v45, %v156_v44 }
  0x85   : > { %v207_v48 = vadd.f32 %v206_v47, %v204_v46 }
  0x87   : > { %208 = vst [vmem:[#allocation2] sm:$0x1] %v207_v48 }
  0x8e   : > { %v212_v49 = vld [vmem:[#allocation2] sm:$0x1] }
  0x8f   : > { %v214_v50 = vsel %vm213_vm2, %v212_v49, 0.0 }
  0x90   : > { %215 = vadd.xlane.f32.xlu0 %v214_v50 }
 0x11d   : > { %v216_v51 = vpop.xlane.xlu0 %215 }
 0x11e   : > { %v217_v52 = vrot.slane %v216_v51, 4 }
 0x120   : > { %v218_v53 = vadd.f32 %v217_v52, %v216_v51 }
 0x122   : > { %v219_v54 = vrot.slane %v218_v53, 2 }
 0x124   : > { %v220_v55 = vadd.f32 %v219_v54, %v218_v53 }
 0x126   : > { %v221_v56 = vrot.slane %v220_v55, 1 }
 0x128   : > { %v222_v57 = vadd.f32 %v221_v56, %v220_v55 }
 0x12a   : > { %335 = vpush %v222_v57 }
 0x15b   : > { %s336_s2 = spop %335 }
 0x15c   : > { %v224_v58 = vstv %s336_s2 }
 0x15d   : > { %226 = vst [vmem:[%s148_s27] sm:$0xff] %v224_v58 }
 0x15e   : > { %452 = shalt.err (!%p449_p3)
}
 0x15f   : > { %s453_s24 = scalar_lea.hbm %s671_s15, 128  ;;  %s457_s28 = scalar_lea.hbm %s719_s1, 256 }
 0x160   : > { %p454_p4 = scmp.ne.s32.totalorder %s671_s15, %s453_s24  ;;  %p458_p12 = scmp.lt.u32.totalorder %s671_s15, %s719_s1 }
 0x161   : > { %p459_p2 = scmp.lt.u32.totalorder %s457_s28, %s453_s24  ;;  %p461_p8 = scmp.lt.u32.totalorder %s453_s24, %s671_s15 }
 0x162   : > { %p455_p6 = pnand %p454_p4, %p726_p9 }
 0x163   : > { %p460_p5 = por %p459_p2, %p458_p12 }
 0x164   : > { %p456_p7 = pneg %p455_p6 }
 0x165   : > { %p462_p11 = por %p461_p8, %p460_p5 }
 0x167   : > { %p463_p0 = pnand %p462_p11, %p456_p7 }
 0x169   : > { %466 = shalt.err (!%p463_p0)
}
 0x16a   : > { %339 = dma.vmem_to_hbm [thread:$0]  (%p726_p9), %s666_s29, 128, %s671_s15, %s228_s16  }
 0x16b PF: > { %s253_s5 = sand.u32 1, %s501_s6   ;;  %p727_p10 = scmp.ne.s32.totalorder %s724_s21, 0 }
 0x16c   : > { %p728_p13 = scmp.ge.s32.totalorder %s521_s11, 2  ;;  %s254_s18 = scalar_lea.sflag [#allocation5], %s253_s5 }
 0x16e   : > { %p346_p1 = pnand %p728_p13, %p727_p10 }
 0x170   : > { %496 = dma.done.wait (!%p346_p1), %s254_s18, 128  }
 0x171   : > { %498 = vsyncadd (!%p346_p1), %s254_s18, 4294967168  ;;  %s17_s11 = sadd.s32 1, %s521_s11   ;;  %s729_s6 = smov %s505_s7 }
 0x172   : > { %p14_p3 = scmp.ge.s32.totalorder %s17_s11, 4   ;;  %s730_s7 = smov %s509_s8 }
 0x173   : > { %s731_s8 = smov %s595_s20  ;;  %s732_s9 = smov %s517_s10 }
 0x174   : > { %s733_s10 = smov %s735_s14  ;;  %16 = sbr.rel (!%p14_p3) target bundleno = 6 (0x6), region = 77 }
 0x17b   :  { %259 = vsyncpa [#allocation4], 1 }
 0x17c   :  { %261 = vsyncpa [#allocation4 + $0x1], 1 }
 0x17d   :  { %262 = vsyncpa [#allocation5], 1 }
 0x17e   :  { %264 = vsyncpa [#allocation5 + $0x1], 1 }

</bundles_post_ra>
